<compile_context>
chip_gen: v7x
topology: tpu7x:2x2x1
jax: 0.10.0
libtpu: 0.0.40
codegen_flags: <defaults>
</compile_context>

<pallas_src>
import math
import functools

import jax
import jax.numpy as jnp
import numpy as np
from jax import lax
from jax.experimental import pallas as pl
from jax.experimental.pallas import tpu as pltpu


# ----------------------------------------------------------------------------- region math

def _rmac_regions(H, W, L):
    """Replicates the cirtorch rmac region-selection logic (static given H, W, L).

    Returns a list of (row_start, row_len, col_start, col_len); first entry is the
    full-image (global max pool) region.
    """
    ovr = 0.4
    steps = np.array([2, 3, 4, 5, 6, 7], dtype=np.float64)
    w = min(W, H)
    b = (max(H, W) - w) / (steps - 1)
    idx = int(np.argmin(np.abs(((w ** 2 - w * b) / (w ** 2)) - ovr)))
    Wd = 0
    Hd = 0
    if H < W:
        Wd = idx + 1
    elif H > W:
        Hd = idx + 1

    regions = [(0, H, 0, W)]  # global max-pool region
    for l in range(1, L + 1):
        wl = math.floor(2 * w / (l + 1))
        wl2 = math.floor(wl / 2 - 1)
        if l + Wd == 1:
            b = 0.0
        else:
            b = (W - wl) / (l + Wd - 1)
        cenW = [int(math.floor(wl2 + k * b) - wl2) for k in range(l - 1 + Wd + 1)]
        if l + Hd == 1:
            b = 0.0
        else:
            b = (H - wl) / (l + Hd - 1)
        cenH = [int(math.floor(wl2 + k * b) - wl2) for k in range(l - 1 + Hd + 1)]
        for i_ in cenH:
            for j_ in cenW:
                if wl == 0:
                    continue
                regions.append((i_, wl, j_, wl))
    return regions


def _build_plan(H, W, L):
    """Dedup regions (with multiplicities) and group them for row-slab reuse.

    Returns:
      plan: tuple of (i0, ((hl, ((region_idx, j0, wl), ...)), ... ascending hl)) groups.
            All regions sharing a row-window start i0 are chained by ascending height,
            so each x row in the chain is loaded and maxed exactly once.
      counts: per-region multiplicity (duplicates folded into the final weights).
      n_regions: number of unique regions.
    """
    raw = _rmac_regions(H, W, L)
    uniq = {}
    order = []
    for reg in raw:
        if reg not in uniq:
            uniq[reg] = 0
            order.append(reg)
        uniq[reg] += 1
    counts = tuple(uniq[r] for r in order)

    groups = {}
    for ridx, (i0, hl, j0, wl) in enumerate(order):
        groups.setdefault(i0, {}).setdefault(hl, []).append((ridx, j0, wl))
    plan = []
    for i0 in sorted(groups):
        hl_items = tuple((hl, tuple(groups[i0][hl])) for hl in sorted(groups[i0]))
        plan.append((i0, hl_items))
    return tuple(plan), counts, len(order)


# ----------------------------------------------------------------------------- kernel

def _rmac_kernel(x_ref, o_ref, rmax_ref, *, plan, counts, n_regions, eps, c_tile):
    # x_ref:    (Bt, H, W, C)  NHWC batch tile (C on lanes).
    # o_ref:    (Bt, 1, C)     RMAC descriptors for the tile.
    # rmax_ref: (R_pad, C) f32 scratch holding all region channel-maxes of one element.
    Bt, H, W, C = x_ref.shape
    R_pad = rmax_ref.shape[0]
    n_ct = C // c_tile

    in_dtype = x_ref.dtype
    if jnp.issubdtype(in_dtype, jnp.floating):
        fill = jnp.array(-jnp.inf, in_dtype)
    else:  # pragma: no cover - RMAC inputs are float activations
        fill = jnp.array(jnp.iinfo(in_dtype).min, in_dtype)

    # Zero padded scratch rows once so the batched epilogue never touches garbage/NaNs.
    if R_pad > n_regions:
        rmax_ref[pl.ds(n_regions, R_pad - n_regions), :] = jnp.zeros(
            (R_pad - n_regions, C), jnp.float32)

    # Column-window masks, hoisted (computed once, reused across batch/channel tiles).
    col = lax.broadcasted_iota(jnp.int32, (W, 1), 0)
    col_masks = {}
    for (_, hl_items) in plan:
        for (_, wins) in hl_items:
            for (_, j0, wl) in wins:
                if not (j0 == 0 and wl == W) and (j0, wl) not in col_masks:
                    col_masks[(j0, wl)] = (col >= j0) & (col < j0 + wl)

    # Static per-region weights (region multiplicity; 0 on padding rows).
    ridx_iota = lax.broadcasted_iota(jnp.int32, (R_pad, 1), 0)
    weights = (ridx_iota < n_regions).astype(jnp.float32)
    for idx, cnt in enumerate(counts):
        if cnt != 1:
            weights = jnp.where(ridx_iota == idx, float(cnt), weights)

    for b in range(Bt):  # static unroll over the batch tile
        # ---- pass 1: region channel-maxes -> (R_pad, C) scratch ---------------------
        for ct in range(n_ct):
            cs = ct * c_tile
            for (i0, hl_items) in plan:
                # Incremental H-reduction chain shared by every region of this group:
                # each row of x is loaded and maxed exactly once per group (VPU only).
                slab = x_ref[b, i0, :, pl.ds(cs, c_tile)]               # (W, c_tile)
                nrows = 1
                for (hl, wins) in hl_items:                             # ascending hl
                    while nrows < hl:
                        slab = jnp.maximum(slab,
                                           x_ref[b, i0 + nrows, :, pl.ds(cs, c_tile)])
                        nrows += 1
                    for (ridx, j0, wl) in wins:
                        if j0 == 0 and wl == W:
                            win = slab
                        else:
                            win = jnp.where(col_masks[(j0, wl)], slab, fill)
                        # Single cross-sublane (XLU) reduction per region.
                        m = jnp.max(win, axis=0, keepdims=True).astype(jnp.float32)
                        rmax_ref[pl.ds(ridx, 1), pl.ds(cs, c_tile)] = m

        # ---- pass 2: batched L2 norms over all regions ------------------------------
        ss = jnp.zeros((R_pad, 1), jnp.float32)
        for ct in range(n_ct):
            mt = rmax_ref[:, pl.ds(ct * c_tile, c_tile)]                # (R_pad, c_tile)
            ss = ss + jnp.sum(mt * mt, axis=1, keepdims=True)
        denom = jnp.sqrt(ss) + eps                                      # eps AFTER sqrt
        inv = pl.reciprocal(denom, approx=True)                         # EUP fast path
        inv = inv * (2.0 - denom * inv)                                 # Newton step
        wv = inv * weights                                              # (R_pad, 1)

        # ---- pass 3: weighted accumulate -> output -----------------------------------
        for ct in range(n_ct):
            cs = ct * c_tile
            mt = rmax_ref[:, pl.ds(cs, c_tile)]                         # (R_pad, c_tile)
            acc = jnp.sum(mt * wv, axis=0, keepdims=True)               # (1, c_tile)
            o_ref[b, :, pl.ds(cs, c_tile)] = acc.astype(o_ref.dtype)


# ----------------------------------------------------------------------------- wrappers

def _pick_bt(B, H, W, C, itemsize, max_block_bytes=13 * 1024 * 1024):
    """Batch-tile size: divides B, keeps the grid >= 2 steps (megacore), and keeps the
    double-buffered input block comfortably inside v7x's 64 MiB VMEM."""
    per_elem = H * W * C * itemsize
    for cand in (4, 2):
        if B % cand == 0 and (B // cand) >= 2 and cand * per_elem <= max_block_bytes:
            return cand
    return 1


def rmac_nhwc(x_nhwc, L=3, eps=1e-6):
    """RMAC on an NHWC activation tensor. Preferred entry point (no relayout pass).
    Returns (B, 1, C)."""
    B, H, W, C = x_nhwc.shape
    plan, counts, n_regions = _build_plan(H, W, L)
    R_pad = max(8, ((n_regions + 7) // 8) * 8)
    c_tile = 512 if (C % 512 == 0) else C
    Bt = _pick_bt(B, H, W, C, x_nhwc.dtype.itemsize)

    kernel = functools.partial(
        _rmac_kernel, plan=plan, counts=counts, n_regions=n_regions,
        eps=float(eps), c_tile=c_tile)

    out = pl.pallas_call(
        kernel,
        out_shape=jax.ShapeDtypeStruct((B, 1, C), x_nhwc.dtype),
        grid_spec=pltpu.PrefetchScalarGridSpec(
            num_scalar_prefetch=0,
            grid=(B // Bt,),
            in_specs=[pl.BlockSpec((Bt, H, W, C), lambda b: (b, 0, 0, 0))],
            out_specs=pl.BlockSpec((Bt, 1, C), lambda b: (b, 0, 0)),
            scratch_shapes=[pltpu.VMEM((R_pad, C), jnp.float32)],
        ),
        compiler_params=pltpu.CompilerParams(
            dimension_semantics=("parallel",),     # shard batch grid across TCs (v7x)
            vmem_limit_bytes=48 * 1024 * 1024,     # explicit; block sizing keeps us under v7x 64 MiB
        ),
    )(x_nhwc)
    return out  # (B, 1, C)


def rmac(x_nchw, L=3, eps=1e-6):
    """PyTorch-compatible entry point: NCHW in, (B, C, 1, 1) out.

    NOTE: the NCHW->NHWC transpose is an extra HBM pass; producers that can emit NHWC
    should call rmac_nhwc directly (dominant cost on HBM-bound v5e/v6e).
    # TODO(synk): consume NHWC end-to-end (or add an NCHW-native variant) to drop this pass.
    """
    B, C, H, W = x_nchw.shape
    x = jnp.transpose(x_nchw, (0, 2, 3, 1))  # NCHW -> NHWC (channels on lanes)
    out = rmac_nhwc(x, L=L, eps=eps)
    return out.reshape(B, C, 1, 1)


def rmac_ref(x_nchw, L=3, eps=1e-6):
    """Pure-JAX reference (same math, NCHW, exact division) for correctness checking."""
    B, C, H, W = x_nchw.shape
    regions = _rmac_regions(H, W, L)
    v = jnp.zeros((B, C), jnp.float32)
    for (i0, hl, j0, wl) in regions:
        r = x_nchw[:, :, i0:i0 + hl, j0:j0 + wl]
        m = jnp.max(r, axis=(2, 3)).astype(jnp.float32)
        n = jnp.sqrt(jnp.sum(m * m, axis=1, keepdims=True)) + eps
        v = v + m / n
    return v.astype(x_nchw.dtype).reshape(B, C, 1, 1)


if __name__ == "__main__":
    # RMAC has no learnable parameters (only hyperparameters L, eps).
    key = jax.random.PRNGKey(0)
    x = jax.random.normal(key, (2, 4, 16, 16), dtype=jnp.float32)  # NCHW, like PyTorch

    out = jax.block_until_ready(rmac(x, L=3, eps=1e-6))
    ref = jax.block_until_ready(rmac_ref(x, L=3, eps=1e-6))

    assert out.shape == (2, 4, 1, 1), out.shape
    # Approx reciprocal + one Newton step is ~f32-exact, so the tolerance is tight.
    np.testing.assert_allclose(np.asarray(out), np.asarray(ref), rtol=1e-5, atol=1e-5)
    print("KERNEL_OK")
</pallas_src>

<mosaic_0001>
module attributes {stable_mosaic.version = 11 : i64} {
  func.func @_rmac_kernel(%arg0: i32, %arg1: memref<1x16x16x4xf32, #tpu.memory_space<vmem>>, %arg2: memref<1x1x4xf32, #tpu.memory_space<vmem>>, %arg3: memref<16x4xf32, #tpu.memory_space<vmem>>) attributes {dimension_semantics = [#tpu.dimension_semantics<parallel>], iteration_bounds = array<i64: 2>, scalar_prefetch = 0 : i64, scratch_operands = 1 : i64, tpu.core_type = #tpu.core_type<tc>, window_params = [{transform_indices = @transform_0, window_bounds = array<i64: 1, 16, 16, 4>}, {transform_indices = @transform_1, window_bounds = array<i64: 1, 1, 4>}]} {
    %cst = arith.constant 0.000000e+00 : f32
    %0 = vector.broadcast %cst : f32 to vector<2x4xf32>
    %c14 = arith.constant 14 : index
    %c0 = arith.constant 0 : index
    %1 = vector.load %arg3[%c14, %c0] : memref<16x4xf32, #tpu.memory_space<vmem>>, vector<2x4xf32>
    tpu.vector_store %arg3[%c14, %c0], %0 {strides = array<i32>} : memref<16x4xf32, #tpu.memory_space<vmem>>, vector<2x4xf32>,
    %2 = tpu.iota {dimensions = array<i32: 0>} : vector<16x1xi32>
    %c0_i32 = arith.constant 0 : i32
    %3 = vector.broadcast %c0_i32 : i32 to vector<16x1xi32>
    %4 = arith.cmpi sge, %2, %3 : vector<16x1xi32>
    %c8_i32 = arith.constant 8 : i32
    %5 = vector.broadcast %c8_i32 : i32 to vector<16x1xi32>
    %6 = arith.cmpi slt, %2, %5 : vector<16x1xi32>
    %7 = arith.andi %4, %6 : vector<16x1xi1>
    %c4_i32 = arith.constant 4 : i32
    %8 = vector.broadcast %c4_i32 : i32 to vector<16x1xi32>
    %9 = arith.cmpi sge, %2, %8 : vector<16x1xi32>
    %c12_i32 = arith.constant 12 : i32
    %10 = vector.broadcast %c12_i32 : i32 to vector<16x1xi32>
    %11 = arith.cmpi slt, %2, %10 : vector<16x1xi32>
    %12 = arith.andi %9, %11 : vector<16x1xi1>
    %c8_i32_0 = arith.constant 8 : i32
    %13 = vector.broadcast %c8_i32_0 : i32 to vector<16x1xi32>
    %14 = arith.cmpi sge, %2, %13 : vector<16x1xi32>
    %c16_i32 = arith.constant 16 : i32
    %15 = vector.broadcast %c16_i32 : i32 to vector<16x1xi32>
    %16 = arith.cmpi slt, %2, %15 : vector<16x1xi32>
    %17 = arith.andi %14, %16 : vector<16x1xi1>
    %c0_i32_1 = arith.constant 0 : i32
    %18 = vector.broadcast %c0_i32_1 : i32 to vector<16x1xi32>
    %19 = arith.cmpi sge, %2, %18 : vector<16x1xi32>
    %c10_i32 = arith.constant 10 : i32
    %20 = vector.broadcast %c10_i32 : i32 to vector<16x1xi32>
    %21 = arith.cmpi slt, %2, %20 : vector<16x1xi32>
    %22 = arith.andi %19, %21 : vector<16x1xi1>
    %c6_i32 = arith.constant 6 : i32
    %23 = vector.broadcast %c6_i32 : i32 to vector<16x1xi32>
    %24 = arith.cmpi sge, %2, %23 : vector<16x1xi32>
    %c16_i32_2 = arith.constant 16 : i32
    %25 = vector.broadcast %c16_i32_2 : i32 to vector<16x1xi32>
    %26 = arith.cmpi slt, %2, %25 : vector<16x1xi32>
    %27 = arith.andi %24, %26 : vector<16x1xi1>
    %28 = tpu.iota {dimensions = array<i32: 0>} : vector<16x1xi32>
    %c14_i32 = arith.constant 14 : i32
    %29 = vector.broadcast %c14_i32 : i32 to vector<16x1xi32>
    %30 = arith.cmpi slt, %28, %29 : vector<16x1xi32>
    %31 = arith.extui %30 : vector<16x1xi1> to vector<16x1xi32>
    %32 = arith.sitofp %31 : vector<16x1xi32> to vector<16x1xf32>
    %c0_i32_3 = arith.constant 0 : i32
    %33 = vector.broadcast %c0_i32_3 : i32 to vector<16x1xi32>
    %34 = arith.cmpi eq, %28, %33 : vector<16x1xi32>
    %cst_4 = arith.constant 2.000000e+00 : f32
    %35 = vector.broadcast %cst_4 : f32 to vector<16x1xf32>
    %36 = arith.select %34, %35, %32 : vector<16x1xi1>, vector<16x1xf32>
    %c0_5 = arith.constant 0 : index
    %c0_6 = arith.constant 0 : index
    %c0_7 = arith.constant 0 : index
    %c0_8 = arith.constant 0 : index
    %37 = vector.load %arg1[%c0_5, %c0_6, %c0_7, %c0_8] : memref<1x16x16x4xf32, #tpu.memory_space<vmem>>, vector<1x1x16x4xf32>
    %38 = vector.shape_cast %37 : vector<1x1x16x4xf32> to vector<16x4xf32>
    %c0_9 = arith.constant 0 : index
    %c1 = arith.constant 1 : index
    %c0_10 = arith.constant 0 : index
    %c0_11 = arith.constant 0 : index
    %39 = vector.load %arg1[%c0_9, %c1, %c0_10, %c0_11] : memref<1x16x16x4xf32, #tpu.memory_space<vmem>>, vector<1x1x16x4xf32>
    %40 = vector.shape_cast %39 : vector<1x1x16x4xf32> to vector<16x4xf32>
    %41 = arith.maximumf %38, %40 : vector<16x4xf32>
    %c0_12 = arith.constant 0 : index
    %c2 = arith.constant 2 : index
    %c0_13 = arith.constant 0 : index
    %c0_14 = arith.constant 0 : index
    %42 = vector.load %arg1[%c0_12, %c2, %c0_13, %c0_14] : memref<1x16x16x4xf32, #tpu.memory_space<vmem>>, vector<1x1x16x4xf32>
    %43 = vector.shape_cast %42 : vector<1x1x16x4xf32> to vector<16x4xf32>
    %44 = arith.maximumf %41, %43 : vector<16x4xf32>
    %c0_15 = arith.constant 0 : index
    %c3 = arith.constant 3 : index
    %c0_16 = arith.constant 0 : index
    %c0_17 = arith.constant 0 : index
    %45 = vector.load %arg1[%c0_15, %c3, %c0_16, %c0_17] : memref<1x16x16x4xf32, #tpu.memory_space<vmem>>, vector<1x1x16x4xf32>
    %46 = vector.shape_cast %45 : vector<1x1x16x4xf32> to vector<16x4xf32>
    %47 = arith.maximumf %44, %46 : vector<16x4xf32>
    %c0_18 = arith.constant 0 : index
    %c4 = arith.constant 4 : index
    %c0_19 = arith.constant 0 : index
    %c0_20 = arith.constant 0 : index
    %48 = vector.load %arg1[%c0_18, %c4, %c0_19, %c0_20] : memref<1x16x16x4xf32, #tpu.memory_space<vmem>>, vector<1x1x16x4xf32>
    %49 = vector.shape_cast %48 : vector<1x1x16x4xf32> to vector<16x4xf32>
    %50 = arith.maximumf %47, %49 : vector<16x4xf32>
    %c0_21 = arith.constant 0 : index
    %c5 = arith.constant 5 : index
    %c0_22 = arith.constant 0 : index
    %c0_23 = arith.constant 0 : index
    %51 = vector.load %arg1[%c0_21, %c5, %c0_22, %c0_23] : memref<1x16x16x4xf32, #tpu.memory_space<vmem>>, vector<1x1x16x4xf32>
    %52 = vector.shape_cast %51 : vector<1x1x16x4xf32> to vector<16x4xf32>
    %53 = arith.maximumf %50, %52 : vector<16x4xf32>
    %c0_24 = arith.constant 0 : index
    %c6 = arith.constant 6 : index
    %c0_25 = arith.constant 0 : index
    %c0_26 = arith.constant 0 : index
    %54 = vector.load %arg1[%c0_24, %c6, %c0_25, %c0_26] : memref<1x16x16x4xf32, #tpu.memory_space<vmem>>, vector<1x1x16x4xf32>
    %55 = vector.shape_cast %54 : vector<1x1x16x4xf32> to vector<16x4xf32>
    %56 = arith.maximumf %53, %55 : vector<16x4xf32>
    %c0_27 = arith.constant 0 : index
    %c7 = arith.constant 7 : index
    %c0_28 = arith.constant 0 : index
    %c0_29 = arith.constant 0 : index
    %57 = vector.load %arg1[%c0_27, %c7, %c0_28, %c0_29] : memref<1x16x16x4xf32, #tpu.memory_space<vmem>>, vector<1x1x16x4xf32>
    %58 = vector.shape_cast %57 : vector<1x1x16x4xf32> to vector<16x4xf32>
    %59 = arith.maximumf %56, %58 : vector<16x4xf32>
    %cst_30 = arith.constant 0xFF800000 : f32
    %60 = vector.shape_cast %7 : vector<16x1xi1> to vector<16x1xi1>
    %61 = vector.broadcast %60 : vector<16x1xi1> to vector<16x4xi1>
    %62 = vector.broadcast %cst_30 : f32 to vector<16x4xf32>
    %63 = arith.select %61, %59, %62 : vector<16x4xi1>, vector<16x4xf32>
    %cst_31 = arith.constant dense<0xFF800000> : vector<4xf32>
    %64 = vector.multi_reduction <maximumf>, %63, %cst_31 [0] : vector<16x4xf32> to vector<4xf32>
    %65 = vector.shape_cast %64 : vector<4xf32> to vector<1x4xf32>
    %c5_32 = arith.constant 5 : index
    %c0_33 = arith.constant 0 : index
    %66 = vector.load %arg3[%c5_32, %c0_33] : memref<16x4xf32, #tpu.memory_space<vmem>>, vector<1x4xf32>
    tpu.vector_store %arg3[%c5_32, %c0_33], %65 {strides = array<i32>} : memref<16x4xf32, #tpu.memory_space<vmem>>, vector<1x4xf32>,
    %cst_34 = arith.constant 0xFF800000 : f32
    %67 = vector.shape_cast %12 : vector<16x1xi1> to vector<16x1xi1>
    %68 = vector.broadcast %67 : vector<16x1xi1> to vector<16x4xi1>
    %69 = vector.broadcast %cst_34 : f32 to vector<16x4xf32>
    %70 = arith.select %68, %59, %69 : vector<16x4xi1>, vector<16x4xf32>
    %cst_35 = arith.constant dense<0xFF800000> : vector<4xf32>
    %71 = vector.multi_reduction <maximumf>, %70, %cst_35 [0] : vector<16x4xf32> to vector<4xf32>
    %72 = vector.shape_cast %71 : vector<4xf32> to vector<1x4xf32>
    %c6_36 = arith.constant 6 : index
    %c0_37 = arith.constant 0 : index
    %73 = vector.load %arg3[%c6_36, %c0_37] : memref<16x4xf32, #tpu.memory_space<vmem>>, vector<1x4xf32>
    tpu.vector_store %arg3[%c6_36, %c0_37], %72 {strides = array<i32>} : memref<16x4xf32, #tpu.memory_space<vmem>>, vector<1x4xf32>,
    %cst_38 = arith.constant 0xFF800000 : f32
    %74 = vector.shape_cast %17 : vector<16x1xi1> to vector<16x1xi1>
    %75 = vector.broadcast %74 : vector<16x1xi1> to vector<16x4xi1>
    %76 = vector.broadcast %cst_38 : f32 to vector<16x4xf32>
    %77 = arith.select %75, %59, %76 : vector<16x4xi1>, vector<16x4xf32>
    %cst_39 = arith.constant dense<0xFF800000> : vector<4xf32>
    %78 = vector.multi_reduction <maximumf>, %77, %cst_39 [0] : vector<16x4xf32> to vector<4xf32>
    %79 = vector.shape_cast %78 : vector<4xf32> to vector<1x4xf32>
    %c7_40 = arith.constant 7 : index
    %c0_41 = arith.constant 0 : index
    %80 = vector.load %arg3[%c7_40, %c0_41] : memref<16x4xf32, #tpu.memory_space<vmem>>, vector<1x4xf32>
    tpu.vector_store %arg3[%c7_40, %c0_41], %79 {strides = array<i32>} : memref<16x4xf32, #tpu.memory_space<vmem>>, vector<1x4xf32>,
    %c0_42 = arith.constant 0 : index
    %c8 = arith.constant 8 : index
    %c0_43 = arith.constant 0 : index
    %c0_44 = arith.constant 0 : index
    %81 = vector.load %arg1[%c0_42, %c8, %c0_43, %c0_44] : memref<1x16x16x4xf32, #tpu.memory_space<vmem>>, vector<1x1x16x4xf32>
    %82 = vector.shape_cast %81 : vector<1x1x16x4xf32> to vector<16x4xf32>
    %83 = arith.maximumf %59, %82 : vector<16x4xf32>
    %c0_45 = arith.constant 0 : index
    %c9 = arith.constant 9 : index
    %c0_46 = arith.constant 0 : index
    %c0_47 = arith.constant 0 : index
    %84 = vector.load %arg1[%c0_45, %c9, %c0_46, %c0_47] : memref<1x16x16x4xf32, #tpu.memory_space<vmem>>, vector<1x1x16x4xf32>
    %85 = vector.shape_cast %84 : vector<1x1x16x4xf32> to vector<16x4xf32>
    %86 = arith.maximumf %83, %85 : vector<16x4xf32>
    %cst_48 = arith.constant 0xFF800000 : f32
    %87 = vector.shape_cast %22 : vector<16x1xi1> to vector<16x1xi1>
    %88 = vector.broadcast %87 : vector<16x1xi1> to vector<16x4xi1>
    %89 = vector.broadcast %cst_48 : f32 to vector<16x4xf32>
    %90 = arith.select %88, %86, %89 : vector<16x4xi1>, vector<16x4xf32>
    %cst_49 = arith.constant dense<0xFF800000> : vector<4xf32>
    %91 = vector.multi_reduction <maximumf>, %90, %cst_49 [0] : vector<16x4xf32> to vector<4xf32>
    %92 = vector.shape_cast %91 : vector<4xf32> to vector<1x4xf32>
    %c1_50 = arith.constant 1 : index
    %c0_51 = arith.constant 0 : index
    %93 = vector.load %arg3[%c1_50, %c0_51] : memref<16x4xf32, #tpu.memory_space<vmem>>, vector<1x4xf32>
    tpu.vector_store %arg3[%c1_50, %c0_51], %92 {strides = array<i32>} : memref<16x4xf32, #tpu.memory_space<vmem>>, vector<1x4xf32>,
    %cst_52 = arith.constant 0xFF800000 : f32
    %94 = vector.shape_cast %27 : vector<16x1xi1> to vector<16x1xi1>
    %95 = vector.broadcast %94 : vector<16x1xi1> to vector<16x4xi1>
    %96 = vector.broadcast %cst_52 : f32 to vector<16x4xf32>
    %97 = arith.select %95, %86, %96 : vector<16x4xi1>, vector<16x4xf32>
    %cst_53 = arith.constant dense<0xFF800000> : vector<4xf32>
    %98 = vector.multi_reduction <maximumf>, %97, %cst_53 [0] : vector<16x4xf32> to vector<4xf32>
    %99 = vector.shape_cast %98 : vector<4xf32> to vector<1x4xf32>
    %c2_54 = arith.constant 2 : index
    %c0_55 = arith.constant 0 : index
    %100 = vector.load %arg3[%c2_54, %c0_55] : memref<16x4xf32, #tpu.memory_space<vmem>>, vector<1x4xf32>
    tpu.vector_store %arg3[%c2_54, %c0_55], %99 {strides = array<i32>} : memref<16x4xf32, #tpu.memory_space<vmem>>, vector<1x4xf32>,
    %c0_56 = arith.constant 0 : index
    %c10 = arith.constant 10 : index
    %c0_57 = arith.constant 0 : index
    %c0_58 = arith.constant 0 : index
    %101 = vector.load %arg1[%c0_56, %c10, %c0_57, %c0_58] : memref<1x16x16x4xf32, #tpu.memory_space<vmem>>, vector<1x1x16x4xf32>
    %102 = vector.shape_cast %101 : vector<1x1x16x4xf32> to vector<16x4xf32>
    %103 = arith.maximumf %86, %102 : vector<16x4xf32>
    %c0_59 = arith.constant 0 : index
    %c11 = arith.constant 11 : index
    %c0_60 = arith.constant 0 : index
    %c0_61 = arith.constant 0 : index
    %104 = vector.load %arg1[%c0_59, %c11, %c0_60, %c0_61] : memref<1x16x16x4xf32, #tpu.memory_space<vmem>>, vector<1x1x16x4xf32>
    %105 = vector.shape_cast %104 : vector<1x1x16x4xf32> to vector<16x4xf32>
    %106 = arith.maximumf %103, %105 : vector<16x4xf32>
    %c0_62 = arith.constant 0 : index
    %c12 = arith.constant 12 : index
    %c0_63 = arith.constant 0 : index
    %c0_64 = arith.constant 0 : index
    %107 = vector.load %arg1[%c0_62, %c12, %c0_63, %c0_64] : memref<1x16x16x4xf32, #tpu.memory_space<vmem>>, vector<1x1x16x4xf32>
    %108 = vector.shape_cast %107 : vector<1x1x16x4xf32> to vector<16x4xf32>
    %109 = arith.maximumf %106, %108 : vector<16x4xf32>
    %c0_65 = arith.constant 0 : index
    %c13 = arith.constant 13 : index
    %c0_66 = arith.constant 0 : index
    %c0_67 = arith.constant 0 : index
    %110 = vector.load %arg1[%c0_65, %c13, %c0_66, %c0_67] : memref<1x16x16x4xf32, #tpu.memory_space<vmem>>, vector<1x1x16x4xf32>
    %111 = vector.shape_cast %110 : vector<1x1x16x4xf32> to vector<16x4xf32>
    %112 = arith.maximumf %109, %111 : vector<16x4xf32>
    %c0_68 = arith.constant 0 : index
    %c14_69 = arith.constant 14 : index
    %c0_70 = arith.constant 0 : index
    %c0_71 = arith.constant 0 : index
    %113 = vector.load %arg1[%c0_68, %c14_69, %c0_70, %c0_71] : memref<1x16x16x4xf32, #tpu.memory_space<vmem>>, vector<1x1x16x4xf32>
    %114 = vector.shape_cast %113 : vector<1x1x16x4xf32> to vector<16x4xf32>
    %115 = arith.maximumf %112, %114 : vector<16x4xf32>
    %c0_72 = arith.constant 0 : index
    %c15 = arith.constant 15 : index
    %c0_73 = arith.constant 0 : index
    %c0_74 = arith.constant 0 : index
    %116 = vector.load %arg1[%c0_72, %c15, %c0_73, %c0_74] : memref<1x16x16x4xf32, #tpu.memory_space<vmem>>, vector<1x1x16x4xf32>
    %117 = vector.shape_cast %116 : vector<1x1x16x4xf32> to vector<16x4xf32>
    %118 = arith.maximumf %115, %117 : vector<16x4xf32>
    %cst_75 = arith.constant dense<0xFF800000> : vector<4xf32>
    %119 = vector.multi_reduction <maximumf>, %118, %cst_75 [0] : vector<16x4xf32> to vector<4xf32>
    %120 = vector.shape_cast %119 : vector<4xf32> to vector<1x4xf32>
    %c0_76 = arith.constant 0 : index
    %c0_77 = arith.constant 0 : index
    %121 = vector.load %arg3[%c0_76, %c0_77] : memref<16x4xf32, #tpu.memory_space<vmem>>, vector<1x4xf32>
    tpu.vector_store %arg3[%c0_76, %c0_77], %120 {strides = array<i32>} : memref<16x4xf32, #tpu.memory_space<vmem>>, vector<1x4xf32>,
    %c0_78 = arith.constant 0 : index
    %c4_79 = arith.constant 4 : index
    %c0_80 = arith.constant 0 : index
    %c0_81 = arith.constant 0 : index
    %122 = vector.load %arg1[%c0_78, %c4_79, %c0_80, %c0_81] : memref<1x16x16x4xf32, #tpu.memory_space<vmem>>, vector<1x1x16x4xf32>
    %123 = vector.shape_cast %122 : vector<1x1x16x4xf32> to vector<16x4xf32>
    %c0_82 = arith.constant 0 : index
    %c5_83 = arith.constant 5 : index
    %c0_84 = arith.constant 0 : index
    %c0_85 = arith.constant 0 : index
    %124 = vector.load %arg1[%c0_82, %c5_83, %c0_84, %c0_85] : memref<1x16x16x4xf32, #tpu.memory_space<vmem>>, vector<1x1x16x4xf32>
    %125 = vector.shape_cast %124 : vector<1x1x16x4xf32> to vector<16x4xf32>
    %126 = arith.maximumf %123, %125 : vector<16x4xf32>
    %c0_86 = arith.constant 0 : index
    %c6_87 = arith.constant 6 : index
    %c0_88 = arith.constant 0 : index
    %c0_89 = arith.constant 0 : index
    %127 = vector.load %arg1[%c0_86, %c6_87, %c0_88, %c0_89] : memref<1x16x16x4xf32, #tpu.memory_space<vmem>>, vector<1x1x16x4xf32>
    %128 = vector.shape_cast %127 : vector<1x1x16x4xf32> to vector<16x4xf32>
    %129 = arith.maximumf %126, %128 : vector<16x4xf32>
    %c0_90 = arith.constant 0 : index
    %c7_91 = arith.constant 7 : index
    %c0_92 = arith.constant 0 : index
    %c0_93 = arith.constant 0 : index
    %130 = vector.load %arg1[%c0_90, %c7_91, %c0_92, %c0_93] : memref<1x16x16x4xf32, #tpu.memory_space<vmem>>, vector<1x1x16x4xf32>
    %131 = vector.shape_cast %130 : vector<1x1x16x4xf32> to vector<16x4xf32>
    %132 = arith.maximumf %129, %131 : vector<16x4xf32>
    %c0_94 = arith.constant 0 : index
    %c8_95 = arith.constant 8 : index
    %c0_96 = arith.constant 0 : index
    %c0_97 = arith.constant 0 : index
    %133 = vector.load %arg1[%c0_94, %c8_95, %c0_96, %c0_97] : memref<1x16x16x4xf32, #tpu.memory_space<vmem>>, vector<1x1x16x4xf32>
    %134 = vector.shape_cast %133 : vector<1x1x16x4xf32> to vector<16x4xf32>
    %135 = arith.maximumf %132, %134 : vector<16x4xf32>
    %c0_98 = arith.constant 0 : index
    %c9_99 = arith.constant 9 : index
    %c0_100 = arith.constant 0 : index
    %c0_101 = arith.constant 0 : index
    %136 = vector.load %arg1[%c0_98, %c9_99, %c0_100, %c0_101] : memref<1x16x16x4xf32, #tpu.memory_space<vmem>>, vector<1x1x16x4xf32>
    %137 = vector.shape_cast %136 : vector<1x1x16x4xf32> to vector<16x4xf32>
    %138 = arith.maximumf %135, %137 : vector<16x4xf32>
    %c0_102 = arith.constant 0 : index
    %c10_103 = arith.constant 10 : index
    %c0_104 = arith.constant 0 : index
    %c0_105 = arith.constant 0 : index
    %139 = vector.load %arg1[%c0_102, %c10_103, %c0_104, %c0_105] : memref<1x16x16x4xf32, #tpu.memory_space<vmem>>, vector<1x1x16x4xf32>
    %140 = vector.shape_cast %139 : vector<1x1x16x4xf32> to vector<16x4xf32>
    %141 = arith.maximumf %138, %140 : vector<16x4xf32>
    %c0_106 = arith.constant 0 : index
    %c11_107 = arith.constant 11 : index
    %c0_108 = arith.constant 0 : index
    %c0_109 = arith.constant 0 : index
    %142 = vector.load %arg1[%c0_106, %c11_107, %c0_108, %c0_109] : memref<1x16x16x4xf32, #tpu.memory_space<vmem>>, vector<1x1x16x4xf32>
    %143 = vector.shape_cast %142 : vector<1x1x16x4xf32> to vector<16x4xf32>
    %144 = arith.maximumf %141, %143 : vector<16x4xf32>
    %cst_110 = arith.constant 0xFF800000 : f32
    %145 = vector.shape_cast %7 : vector<16x1xi1> to vector<16x1xi1>
    %146 = vector.broadcast %145 : vector<16x1xi1> to vector<16x4xi1>
    %147 = vector.broadcast %cst_110 : f32 to vector<16x4xf32>
    %148 = arith.select %146, %144, %147 : vector<16x4xi1>, vector<16x4xf32>
    %cst_111 = arith.constant dense<0xFF800000> : vector<4xf32>
    %149 = vector.multi_reduction <maximumf>, %148, %cst_111 [0] : vector<16x4xf32> to vector<4xf32>
    %150 = vector.shape_cast %149 : vector<4xf32> to vector<1x4xf32>
    %c8_112 = arith.constant 8 : index
    %c0_113 = arith.constant 0 : index
    %151 = vector.load %arg3[%c8_112, %c0_113] : memref<16x4xf32, #tpu.memory_space<vmem>>, vector<1x4xf32>
    tpu.vector_store %arg3[%c8_112, %c0_113], %150 {strides = array<i32>} : memref<16x4xf32, #tpu.memory_space<vmem>>, vector<1x4xf32>,
    %cst_114 = arith.constant 0xFF800000 : f32
    %152 = vector.shape_cast %12 : vector<16x1xi1> to vector<16x1xi1>
    %153 = vector.broadcast %152 : vector<16x1xi1> to vector<16x4xi1>
    %154 = vector.broadcast %cst_114 : f32 to vector<16x4xf32>
    %155 = arith.select %153, %144, %154 : vector<16x4xi1>, vector<16x4xf32>
    %cst_115 = arith.constant dense<0xFF800000> : vector<4xf32>
    %156 = vector.multi_reduction <maximumf>, %155, %cst_115 [0] : vector<16x4xf32> to vector<4xf32>
    %157 = vector.shape_cast %156 : vector<4xf32> to vector<1x4xf32>
    %c9_116 = arith.constant 9 : index
    %c0_117 = arith.constant 0 : index
    %158 = vector.load %arg3[%c9_116, %c0_117] : memref<16x4xf32, #tpu.memory_space<vmem>>, vector<1x4xf32>
    tpu.vector_store %arg3[%c9_116, %c0_117], %157 {strides = array<i32>} : memref<16x4xf32, #tpu.memory_space<vmem>>, vector<1x4xf32>,
    %cst_118 = arith.constant 0xFF800000 : f32
    %159 = vector.shape_cast %17 : vector<16x1xi1> to vector<16x1xi1>
    %160 = vector.broadcast %159 : vector<16x1xi1> to vector<16x4xi1>
    %161 = vector.broadcast %cst_118 : f32 to vector<16x4xf32>
    %162 = arith.select %160, %144, %161 : vector<16x4xi1>, vector<16x4xf32>
    %cst_119 = arith.constant dense<0xFF800000> : vector<4xf32>
    %163 = vector.multi_reduction <maximumf>, %162, %cst_119 [0] : vector<16x4xf32> to vector<4xf32>
    %164 = vector.shape_cast %163 : vector<4xf32> to vector<1x4xf32>
    %c10_120 = arith.constant 10 : index
    %c0_121 = arith.constant 0 : index
    %165 = vector.load %arg3[%c10_120, %c0_121] : memref<16x4xf32, #tpu.memory_space<vmem>>, vector<1x4xf32>
    tpu.vector_store %arg3[%c10_120, %c0_121], %164 {strides = array<i32>} : memref<16x4xf32, #tpu.memory_space<vmem>>, vector<1x4xf32>,
    %c0_122 = arith.constant 0 : index
    %c6_123 = arith.constant 6 : index
    %c0_124 = arith.constant 0 : index
    %c0_125 = arith.constant 0 : index
    %166 = vector.load %arg1[%c0_122, %c6_123, %c0_124, %c0_125] : memref<1x16x16x4xf32, #tpu.memory_space<vmem>>, vector<1x1x16x4xf32>
    %167 = vector.shape_cast %166 : vector<1x1x16x4xf32> to vector<16x4xf32>
    %c0_126 = arith.constant 0 : index
    %c7_127 = arith.constant 7 : index
    %c0_128 = arith.constant 0 : index
    %c0_129 = arith.constant 0 : index
    %168 = vector.load %arg1[%c0_126, %c7_127, %c0_128, %c0_129] : memref<1x16x16x4xf32, #tpu.memory_space<vmem>>, vector<1x1x16x4xf32>
    %169 = vector.shape_cast %168 : vector<1x1x16x4xf32> to vector<16x4xf32>
    %170 = arith.maximumf %167, %169 : vector<16x4xf32>
    %c0_130 = arith.constant 0 : index
    %c8_131 = arith.constant 8 : index
    %c0_132 = arith.constant 0 : index
    %c0_133 = arith.constant 0 : index
    %171 = vector.load %arg1[%c0_130, %c8_131, %c0_132, %c0_133] : memref<1x16x16x4xf32, #tpu.memory_space<vmem>>, vector<1x1x16x4xf32>
    %172 = vector.shape_cast %171 : vector<1x1x16x4xf32> to vector<16x4xf32>
    %173 = arith.maximumf %170, %172 : vector<16x4xf32>
    %c0_134 = arith.constant 0 : index
    %c9_135 = arith.constant 9 : index
    %c0_136 = arith.constant 0 : index
    %c0_137 = arith.constant 0 : index
    %174 = vector.load %arg1[%c0_134, %c9_135, %c0_136, %c0_137] : memref<1x16x16x4xf32, #tpu.memory_space<vmem>>, vector<1x1x16x4xf32>
    %175 = vector.shape_cast %174 : vector<1x1x16x4xf32> to vector<16x4xf32>
    %176 = arith.maximumf %173, %175 : vector<16x4xf32>
    %c0_138 = arith.constant 0 : index
    %c10_139 = arith.constant 10 : index
    %c0_140 = arith.constant 0 : index
    %c0_141 = arith.constant 0 : index
    %177 = vector.load %arg1[%c0_138, %c10_139, %c0_140, %c0_141] : memref<1x16x16x4xf32, #tpu.memory_space<vmem>>, vector<1x1x16x4xf32>
    %178 = vector.shape_cast %177 : vector<1x1x16x4xf32> to vector<16x4xf32>
    %179 = arith.maximumf %176, %178 : vector<16x4xf32>
    %c0_142 = arith.constant 0 : index
    %c11_143 = arith.constant 11 : index
    %c0_144 = arith.constant 0 : index
    %c0_145 = arith.constant 0 : index
    %180 = vector.load %arg1[%c0_142, %c11_143, %c0_144, %c0_145] : memref<1x16x16x4xf32, #tpu.memory_space<vmem>>, vector<1x1x16x4xf32>
    %181 = vector.shape_cast %180 : vector<1x1x16x4xf32> to vector<16x4xf32>
    %182 = arith.maximumf %179, %181 : vector<16x4xf32>
    %c0_146 = arith.constant 0 : index
    %c12_147 = arith.constant 12 : index
    %c0_148 = arith.constant 0 : index
    %c0_149 = arith.constant 0 : index
    %183 = vector.load %arg1[%c0_146, %c12_147, %c0_148, %c0_149] : memref<1x16x16x4xf32, #tpu.memory_space<vmem>>, vector<1x1x16x4xf32>
    %184 = vector.shape_cast %183 : vector<1x1x16x4xf32> to vector<16x4xf32>
    %185 = arith.maximumf %182, %184 : vector<16x4xf32>
    %c0_150 = arith.constant 0 : index
    %c13_151 = arith.constant 13 : index
    %c0_152 = arith.constant 0 : index
    %c0_153 = arith.constant 0 : index
    %186 = vector.load %arg1[%c0_150, %c13_151, %c0_152, %c0_153] : memref<1x16x16x4xf32, #tpu.memory_space<vmem>>, vector<1x1x16x4xf32>
    %187 = vector.shape_cast %186 : vector<1x1x16x4xf32> to vector<16x4xf32>
    %188 = arith.maximumf %185, %187 : vector<16x4xf32>
    %c0_154 = arith.constant 0 : index
    %c14_155 = arith.constant 14 : index
    %c0_156 = arith.constant 0 : index
    %c0_157 = arith.constant 0 : index
    %189 = vector.load %arg1[%c0_154, %c14_155, %c0_156, %c0_157] : memref<1x16x16x4xf32, #tpu.memory_space<vmem>>, vector<1x1x16x4xf32>
    %190 = vector.shape_cast %189 : vector<1x1x16x4xf32> to vector<16x4xf32>
    %191 = arith.maximumf %188, %190 : vector<16x4xf32>
    %c0_158 = arith.constant 0 : index
    %c15_159 = arith.constant 15 : index
    %c0_160 = arith.constant 0 : index
    %c0_161 = arith.constant 0 : index
    %192 = vector.load %arg1[%c0_158, %c15_159, %c0_160, %c0_161] : memref<1x16x16x4xf32, #tpu.memory_space<vmem>>, vector<1x1x16x4xf32>
    %193 = vector.shape_cast %192 : vector<1x1x16x4xf32> to vector<16x4xf32>
    %194 = arith.maximumf %191, %193 : vector<16x4xf32>
    %cst_162 = arith.constant 0xFF800000 : f32
    %195 = vector.shape_cast %22 : vector<16x1xi1> to vector<16x1xi1>
    %196 = vector.broadcast %195 : vector<16x1xi1> to vector<16x4xi1>
    %197 = vector.broadcast %cst_162 : f32 to vector<16x4xf32>
    %198 = arith.select %196, %194, %197 : vector<16x4xi1>, vector<16x4xf32>
    %cst_163 = arith.constant dense<0xFF800000> : vector<4xf32>
    %199 = vector.multi_reduction <maximumf>, %198, %cst_163 [0] : vector<16x4xf32> to vector<4xf32>
    %200 = vector.shape_cast %199 : vector<4xf32> to vector<1x4xf32>
    %c3_164 = arith.constant 3 : index
    %c0_165 = arith.constant 0 : index
    %201 = vector.load %arg3[%c3_164, %c0_165] : memref<16x4xf32, #tpu.memory_space<vmem>>, vector<1x4xf32>
    tpu.vector_store %arg3[%c3_164, %c0_165], %200 {strides = array<i32>} : memref<16x4xf32, #tpu.memory_space<vmem>>, vector<1x4xf32>,
    %cst_166 = arith.constant 0xFF800000 : f32
    %202 = vector.shape_cast %27 : vector<16x1xi1> to vector<16x1xi1>
    %203 = vector.broadcast %202 : vector<16x1xi1> to vector<16x4xi1>
    %204 = vector.broadcast %cst_166 : f32 to vector<16x4xf32>
    %205 = arith.select %203, %194, %204 : vector<16x4xi1>, vector<16x4xf32>
    %cst_167 = arith.constant dense<0xFF800000> : vector<4xf32>
    %206 = vector.multi_reduction <maximumf>, %205, %cst_167 [0] : vector<16x4xf32> to vector<4xf32>
    %207 = vector.shape_cast %206 : vector<4xf32> to vector<1x4xf32>
    %c4_168 = arith.constant 4 : index
    %c0_169 = arith.constant 0 : index
    %208 = vector.load %arg3[%c4_168, %c0_169] : memref<16x4xf32, #tpu.memory_space<vmem>>, vector<1x4xf32>
    tpu.vector_store %arg3[%c4_168, %c0_169], %207 {strides = array<i32>} : memref<16x4xf32, #tpu.memory_space<vmem>>, vector<1x4xf32>,
    %c0_170 = arith.constant 0 : index
    %c8_171 = arith.constant 8 : index
    %c0_172 = arith.constant 0 : index
    %c0_173 = arith.constant 0 : index
    %209 = vector.load %arg1[%c0_170, %c8_171, %c0_172, %c0_173] : memref<1x16x16x4xf32, #tpu.memory_space<vmem>>, vector<1x1x16x4xf32>
    %210 = vector.shape_cast %209 : vector<1x1x16x4xf32> to vector<16x4xf32>
    %c0_174 = arith.constant 0 : index
    %c9_175 = arith.constant 9 : index
    %c0_176 = arith.constant 0 : index
    %c0_177 = arith.constant 0 : index
    %211 = vector.load %arg1[%c0_174, %c9_175, %c0_176, %c0_177] : memref<1x16x16x4xf32, #tpu.memory_space<vmem>>, vector<1x1x16x4xf32>
    %212 = vector.shape_cast %211 : vector<1x1x16x4xf32> to vector<16x4xf32>
    %213 = arith.maximumf %210, %212 : vector<16x4xf32>
    %c0_178 = arith.constant 0 : index
    %c10_179 = arith.constant 10 : index
    %c0_180 = arith.constant 0 : index
    %c0_181 = arith.constant 0 : index
    %214 = vector.load %arg1[%c0_178, %c10_179, %c0_180, %c0_181] : memref<1x16x16x4xf32, #tpu.memory_space<vmem>>, vector<1x1x16x4xf32>
    %215 = vector.shape_cast %214 : vector<1x1x16x4xf32> to vector<16x4xf32>
    %216 = arith.maximumf %213, %215 : vector<16x4xf32>
    %c0_182 = arith.constant 0 : index
    %c11_183 = arith.constant 11 : index
    %c0_184 = arith.constant 0 : index
    %c0_185 = arith.constant 0 : index
    %217 = vector.load %arg1[%c0_182, %c11_183, %c0_184, %c0_185] : memref<1x16x16x4xf32, #tpu.memory_space<vmem>>, vector<1x1x16x4xf32>
    %218 = vector.shape_cast %217 : vector<1x1x16x4xf32> to vector<16x4xf32>
    %219 = arith.maximumf %216, %218 : vector<16x4xf32>
    %c0_186 = arith.constant 0 : index
    %c12_187 = arith.constant 12 : index
    %c0_188 = arith.constant 0 : index
    %c0_189 = arith.constant 0 : index
    %220 = vector.load %arg1[%c0_186, %c12_187, %c0_188, %c0_189] : memref<1x16x16x4xf32, #tpu.memory_space<vmem>>, vector<1x1x16x4xf32>
    %221 = vector.shape_cast %220 : vector<1x1x16x4xf32> to vector<16x4xf32>
    %222 = arith.maximumf %219, %221 : vector<16x4xf32>
    %c0_190 = arith.constant 0 : index
    %c13_191 = arith.constant 13 : index
    %c0_192 = arith.constant 0 : index
    %c0_193 = arith.constant 0 : index
    %223 = vector.load %arg1[%c0_190, %c13_191, %c0_192, %c0_193] : memref<1x16x16x4xf32, #tpu.memory_space<vmem>>, vector<1x1x16x4xf32>
    %224 = vector.shape_cast %223 : vector<1x1x16x4xf32> to vector<16x4xf32>
    %225 = arith.maximumf %222, %224 : vector<16x4xf32>
    %c0_194 = arith.constant 0 : index
    %c14_195 = arith.constant 14 : index
    %c0_196 = arith.constant 0 : index
    %c0_197 = arith.constant 0 : index
    %226 = vector.load %arg1[%c0_194, %c14_195, %c0_196, %c0_197] : memref<1x16x16x4xf32, #tpu.memory_space<vmem>>, vector<1x1x16x4xf32>
    %227 = vector.shape_cast %226 : vector<1x1x16x4xf32> to vector<16x4xf32>
    %228 = arith.maximumf %225, %227 : vector<16x4xf32>
    %c0_198 = arith.constant 0 : index
    %c15_199 = arith.constant 15 : index
    %c0_200 = arith.constant 0 : index
    %c0_201 = arith.constant 0 : index
    %229 = vector.load %arg1[%c0_198, %c15_199, %c0_200, %c0_201] : memref<1x16x16x4xf32, #tpu.memory_space<vmem>>, vector<1x1x16x4xf32>
    %230 = vector.shape_cast %229 : vector<1x1x16x4xf32> to vector<16x4xf32>
    %231 = arith.maximumf %228, %230 : vector<16x4xf32>
    %cst_202 = arith.constant 0xFF800000 : f32
    %232 = vector.shape_cast %7 : vector<16x1xi1> to vector<16x1xi1>
    %233 = vector.broadcast %232 : vector<16x1xi1> to vector<16x4xi1>
    %234 = vector.broadcast %cst_202 : f32 to vector<16x4xf32>
    %235 = arith.select %233, %231, %234 : vector<16x4xi1>, vector<16x4xf32>
    %cst_203 = arith.constant dense<0xFF800000> : vector<4xf32>
    %236 = vector.multi_reduction <maximumf>, %235, %cst_203 [0] : vector<16x4xf32> to vector<4xf32>
    %237 = vector.shape_cast %236 : vector<4xf32> to vector<1x4xf32>
    %c11_204 = arith.constant 11 : index
    %c0_205 = arith.constant 0 : index
    %238 = vector.load %arg3[%c11_204, %c0_205] : memref<16x4xf32, #tpu.memory_space<vmem>>, vector<1x4xf32>
    tpu.vector_store %arg3[%c11_204, %c0_205], %237 {strides = array<i32>} : memref<16x4xf32, #tpu.memory_space<vmem>>, vector<1x4xf32>,
    %cst_206 = arith.constant 0xFF800000 : f32
    %239 = vector.shape_cast %12 : vector<16x1xi1> to vector<16x1xi1>
    %240 = vector.broadcast %239 : vector<16x1xi1> to vector<16x4xi1>
    %241 = vector.broadcast %cst_206 : f32 to vector<16x4xf32>
    %242 = arith.select %240, %231, %241 : vector<16x4xi1>, vector<16x4xf32>
    %cst_207 = arith.constant dense<0xFF800000> : vector<4xf32>
    %243 = vector.multi_reduction <maximumf>, %242, %cst_207 [0] : vector<16x4xf32> to vector<4xf32>
    %244 = vector.shape_cast %243 : vector<4xf32> to vector<1x4xf32>
    %c12_208 = arith.constant 12 : index
    %c0_209 = arith.constant 0 : index
    %245 = vector.load %arg3[%c12_208, %c0_209] : memref<16x4xf32, #tpu.memory_space<vmem>>, vector<1x4xf32>
    tpu.vector_store %arg3[%c12_208, %c0_209], %244 {strides = array<i32>} : memref<16x4xf32, #tpu.memory_space<vmem>>, vector<1x4xf32>,
    %cst_210 = arith.constant 0xFF800000 : f32
    %246 = vector.shape_cast %17 : vector<16x1xi1> to vector<16x1xi1>
    %247 = vector.broadcast %246 : vector<16x1xi1> to vector<16x4xi1>
    %248 = vector.broadcast %cst_210 : f32 to vector<16x4xf32>
    %249 = arith.select %247, %231, %248 : vector<16x4xi1>, vector<16x4xf32>
    %cst_211 = arith.constant dense<0xFF800000> : vector<4xf32>
    %250 = vector.multi_reduction <maximumf>, %249, %cst_211 [0] : vector<16x4xf32> to vector<4xf32>
    %251 = vector.shape_cast %250 : vector<4xf32> to vector<1x4xf32>
    %c13_212 = arith.constant 13 : index
    %c0_213 = arith.constant 0 : index
    %252 = vector.load %arg3[%c13_212, %c0_213] : memref<16x4xf32, #tpu.memory_space<vmem>>, vector<1x4xf32>
    tpu.vector_store %arg3[%c13_212, %c0_213], %251 {strides = array<i32>} : memref<16x4xf32, #tpu.memory_space<vmem>>, vector<1x4xf32>,
    %cst_214 = arith.constant 0.000000e+00 : f32
    %253 = vector.broadcast %cst_214 : f32 to vector<16x1xf32>
    %c0_215 = arith.constant 0 : index
    %c0_216 = arith.constant 0 : index
    %254 = vector.load %arg3[%c0_215, %c0_216] : memref<16x4xf32, #tpu.memory_space<vmem>>, vector<16x4xf32>
    %255 = arith.mulf %254, %254 : vector<16x4xf32>
    %cst_217 = arith.constant dense<0.000000e+00> : vector<16xf32>
    %256 = vector.multi_reduction <add>, %255, %cst_217 [1] : vector<16x4xf32> to vector<16xf32>
    %257 = vector.shape_cast %256 : vector<16xf32> to vector<16x1xf32>
    %258 = arith.addf %253, %257 : vector<16x1xf32>
    %259 = math.sqrt %258 : vector<16x1xf32>
    %cst_218 = arith.constant 9.99999997E-7 : f32
    %260 = vector.broadcast %cst_218 : f32 to vector<16x1xf32>
    %261 = arith.addf %259, %260 : vector<16x1xf32>
    %262 = tpu.reciprocal %261 {approx = true} : vector<16x1xf32> -> vector<16x1xf32>
    %263 = arith.mulf %261, %262 : vector<16x1xf32>
    %cst_219 = arith.constant 2.000000e+00 : f32
    %264 = vector.broadcast %cst_219 : f32 to vector<16x1xf32>
    %265 = arith.subf %264, %263 : vector<16x1xf32>
    %266 = arith.mulf %262, %265 : vector<16x1xf32>
    %267 = arith.mulf %266, %36 : vector<16x1xf32>
    %c0_220 = arith.constant 0 : index
    %c0_221 = arith.constant 0 : index
    %268 = vector.load %arg3[%c0_220, %c0_221] : memref<16x4xf32, #tpu.memory_space<vmem>>, vector<16x4xf32>
    %269 = vector.broadcast %267 : vector<16x1xf32> to vector<16x4xf32>
    %270 = arith.mulf %268, %269 : vector<16x4xf32>
    %cst_222 = arith.constant dense<0.000000e+00> : vector<4xf32>
    %271 = vector.multi_reduction <add>, %270, %cst_222 [0] : vector<16x4xf32> to vector<4xf32>
    %272 = vector.shape_cast %271 : vector<4xf32> to vector<1x4xf32>
    %c0_223 = arith.constant 0 : index
    %c0_224 = arith.constant 0 : index
    %c0_225 = arith.constant 0 : index
    %273 = vector.load %arg2[%c0_223, %c0_224, %c0_225] : memref<1x1x4xf32, #tpu.memory_space<vmem>>, vector<1x1x4xf32>
    %274 = vector.shape_cast %273 : vector<1x1x4xf32> to vector<1x4xf32>
    %275 = vector.shape_cast %272 : vector<1x4xf32> to vector<1x1x4xf32>
    tpu.vector_store %arg2[%c0_223, %c0_224, %c0_225], %275 {strides = array<i32>} : memref<1x1x4xf32, #tpu.memory_space<vmem>>, vector<1x1x4xf32>,
    return
  }
  func.func @transform_0(%arg0: i32) -> (i32, i32, i32, i32) {
    %c0_i32 = arith.constant 0 : i32
    %c0_i32_0 = arith.constant 0 : i32
    %c0_i32_1 = arith.constant 0 : i32
    %c0_i32_2 = arith.constant 0 : i32
    return %arg0, %c0_i32, %c0_i32_0, %c0_i32_1 : i32, i32, i32, i32
  }
  func.func @transform_1(%arg0: i32) -> (i32, i32, i32) {
    %c0_i32 = arith.constant 0 : i32
    %c0_i32_0 = arith.constant 0 : i32
    %c0_i32_1 = arith.constant 0 : i32
    return %arg0, %c0_i32, %c0_i32_0 : i32, i32, i32
  }
}

</mosaic_0001>

<bundles_post_ra>
// kernel: tpu_custom_call.1
= control target key start
LH: loop header
LB: loop body
LE: loop exit
PB: predicated region body
PF: predicated region fallthrough
CT: control target
= control target key end

     0   :  { %6 = vsyncpa [#allocation4], 0  ;;  %s1157_s0 = inlined_call_operand.vmem [shape: f32[2,16,16,4], index: 0, kind: input, shape index: {}]   ;;  %s1158_s1 = inlined_call_operand.hbm [shape: f32[2,1,4], index: 1, kind: output, shape index: {}]  }
   0x1   :  { %8 = vsyncpa [#allocation4 + $0x1], 0  ;;  %s855_s6 = smov 0   ;;  %s857_s7 = smov 0  }
   0x2   :  { %s859_s8 = smov 0   ;;  %s861_s9 = smov 0  }
   0x3 LB: > { %s876_s10 = sadd.s32 4294967295, %s840_s9   ;;  %s636_s11 = sadd.s32 4294967294, %s840_s9   ;;  %s840_s9 = sphi %s861_s9, %s1164_s9   ;;  %s836_s8 = sphi %s859_s8, %s1163_s8   ;;  %s832_s7 = sphi %s857_s7, %s1162_s7   ;;  %s828_s6 = sphi %s855_s6, %s1161_s6  }
   0x4   : > { %s880_s12 = sadd.s32 1, %s840_s9   ;;  %s47_s13 = sadd.s32 1, %s836_s8 }
   0x5   : > { %s44_s14 = ssub.s32 %s840_s9, %s880_s12  ;;  %p57_p0 = scmp.ne.s32.totalorder %s836_s8, %s832_s7 }
   0x6   : > { %p45_p1 = scmp.eq.s32.totalorder %s44_s14, 0  ;;  %p58_p2 = scmp.eq.s32.totalorder %s876_s10, 1 }
   0x7   : > { %p63_p3 = scmp.ne.s32.totalorder %s832_s7, %s828_s6  ;;  %p64_p4 = scmp.eq.s32.totalorder %s636_s11, 1 }
   0x8   : > { %s891_s15 = scalar_select %p45_p1, %s836_s8, %s47_s13  }
   0x9   : > { %p893_p5 = por %p58_p2, %p57_p0  ;;  %p897_p6 = por %p64_p4, %p63_p3 }
   0xa   : > { %p639_p7 = scmp.ge.s32.totalorder %s840_s9, 1  ;;  %p90_p8 = scmp.lt.s32.totalorder %s840_s9, 3 }
   0xc   : > { %p91_p9 = pnand %p639_p7, %p90_p8 }
   0xd   : > { %p109_p10 = scmp.lt.s32.totalorder (!%p91_p9), %s876_s10, 1  ;;  %v116_v0 = vlaneseq (!%p91_p9)  ;;  %vm114_vm0 = vcmask (!%p91_p9), 25600   ;;  %v842_v1 = vmov (!%p91_p9), 0.0   ;;  %vm198_vm3 = vcmask (!%p91_p9), 31744   ;;  %s107_s23 = sand.u32 (!%p91_p9), 1, %s832_s7  }
   0xe   : > { %94 = sbr.rel (%p91_p9) target bundleno = 309 (0x135), region = 24  ;;  %115 = vst.msk [vmem:[#allocation2 + $0xe] sm:$0x3] (!%p91_p9), %vm114_vm0, %v842_v1  ;;  %vm208_vm6 = vcmask (!%p91_p9), 24576   ;;  %s725_s24 = sshll.u32 (!%p91_p9), %s876_s10, 4 }
   0xf   : > { %v906_v2 = vshrl.u32 (!%p91_p9), %v116_v0, 7  ;;  %s108_s25 = scalar_lea.vmem (!%p91_p9), [#allocation3], %s107_s23  ;;  %s1114_s29 = scalar_lea.hbm (!%p91_p9), %s1158_s1, %s725_s24 }
  0x10   : > { %s581_s26 = sshll.u32 (!%p91_p9), %s108_s25, 4  ;;  %s569_s30 = scalar_lea.sflag (!%p91_p9), [#allocation4], %s107_s23  ;;  %s1116_s26 = int_to_ptr.vmem [resolvable:$true] %s581_s26 }
  0x11   : > { %v917_v6 = vadd.s32 (!%p91_p9), 8, %v906_v2  ;;  %vm125_vm1 = vcmp.ge.s32.totalorder (!%p91_p9), %v906_v2, 4  ;;  %vm141_vm4 = vcmp.ge.s32.totalorder (!%p91_p9), %v906_v2, 6  ;;  %vm151_vm11 = vcmp.eq.s32.totalorder (!%p91_p9), %v906_v2, 0  ;;  %s778_s2 = scalar_lea.vmem (!%p91_p9), %s1116_s26, 16  ;;  %s844_s3 = smov (!%p91_p9), [#allocation3]  }
  0x12   : > { %p779_p11 = scmp.ne.s32.totalorder (!%p91_p9), %s1116_s26, %s778_s2  ;;  %s782_s4 = sshll.u32 (!%p91_p9), %s844_s3, 4  ;;  %s783_s4 = int_to_ptr.vmem [resolvable:$false] %s782_s4 }
  0x13   : > { %vm128_vm2 = vcmp.lt.s32.totalorder (!%p91_p9), %v917_v6, 12  ;;  %vm138_vm5 = vcmp.lt.s32.totalorder (!%p91_p9), %v917_v6, 10  ;;  %vm146_vm12 = vcmp.lt.s32.totalorder (!%p91_p9), %v917_v6, 14  ;;  %s784_s5 = scalar_lea.vmem (!%p91_p9), %s783_s4, 32  ;;  %p785_p0 = scmp.lt.s32.totalorder (!%p91_p9), %s1116_s26, %s783_s4 }
  0x14   : > { %p780_p12 = pnand (!%p91_p9), %p779_p11, %p893_p5  ;;  %p786_p1 = scmp.lt.s32.totalorder (!%p91_p9), %s784_s5, %s778_s2 }
  0x15   : > { %s110_s18 = scalar_select %p109_p10, %s876_s10, 1 }
  0x16   : > { %p781_p13 = pneg %p780_p12  ;;  %p787_p2 = por %p786_p1, %p785_p0 }
  0x17   : > { %s728_s19 = sshll.u32 %s110_s18, 8 }
  0x18   : > { %s911_s22 = scalar_lea.vmem %s1157_s0, %s728_s19  ;;  %p788_p3 = pnand %p787_p2, %p781_p13 }
  0x19   : > { %v155_v3 = vld [vmem:[%s911_s22] sm:$0xff]  ;;  %v156_v4 = vld [vmem:[%s911_s22 + $0x8] sm:$0xff]  ;;  %v643_v5 = vld [vmem:[%s911_s22 + $0x10] sm:$0xff] }
  0x1a   : > { %v644_v7 = vld [vmem:[%s911_s22 + $0x18] sm:$0xff]  ;;  %v160_v8 = vmax.f32 %v155_v3, %v643_v5  ;;  %v645_v9 = vld [vmem:[%s911_s22 + $0x20] sm:$0xff]  ;;  %v646_v10 = vld [vmem:[%s911_s22 + $0x28] sm:$0xff] }
  0x1b   : > { %v161_v11 = vmax.f32 %v156_v4, %v644_v7  ;;  %v647_v12 = vld [vmem:[%s911_s22 + $0x30] sm:$0xff]  ;;  %v648_v13 = vld [vmem:[%s911_s22 + $0x38] sm:$0xff]  ;;  %v649_v14 = vld [vmem:[%s911_s22 + $0x40] sm:$0xff] }
  0x1c   : > { %v165_v15 = vmax.f32 %v160_v8, %v645_v9  ;;  %v650_v16 = vld [vmem:[%s911_s22 + $0x48] sm:$0xff]  ;;  %v651_v17 = vld [vmem:[%s911_s22 + $0x50] sm:$0xff]  ;;  %v652_v18 = vld [vmem:[%s911_s22 + $0x58] sm:$0xff] }
  0x1d   : > { %v166_v19 = vmax.f32 %v161_v11, %v646_v10  ;;  %v653_v20 = vld [vmem:[%s911_s22 + $0x60] sm:$0xff]  ;;  %v654_v21 = vld [vmem:[%s911_s22 + $0x68] sm:$0xff]  ;;  %v655_v22 = vld [vmem:[%s911_s22 + $0x70] sm:$0xff]  ;;  %v328_v23 = vmax.f32 %v649_v14, %v651_v17  ;;  %v329_v24 = vmax.f32 %v650_v16, %v652_v18 }
  0x1e   : > { %v170_v25 = vmax.f32 %v165_v15, %v647_v12  ;;  %v656_v26 = vld [vmem:[%s911_s22 + $0x78] sm:$0xff]  ;;  %v935_v27 = vld [vmem:[%s911_s22 + $0x80] sm:$0xff]  ;;  %v938_v28 = vld [vmem:[%s911_s22 + $0x88] sm:$0xff]  ;;  %v394_v29 = vmax.f32 %v653_v20, %v655_v22 }
  0x1f   : > { %v171_v30 = vmax.f32 %v166_v19, %v648_v13  ;;  %v659_v31 = vld [vmem:[%s911_s22 + $0x90] sm:$0xff]  ;;  %v942_v32 = vld [vmem:[%s911_s22 + $0x98] sm:$0xff]  ;;  %v395_v33 = vmax.f32 %v654_v21, %v656_v26  ;;  %v332_v34 = vmax.f32 %v328_v23, %v653_v20  ;;  %v333_v35 = vmax.f32 %v329_v24, %v654_v21  ;;  %v950_v41 = vld [vmem:[%s911_s22 + $0xa0] sm:$0xff] }
  0x20   : > { %v175_v36 = vmax.f32 %v170_v25, %v649_v14  ;;  %v398_v37 = vmax.f32 %v394_v29, %v935_v27  ;;  %v456_v38 = vmax.f32 %v935_v27, %v659_v31  ;;  %v457_v39 = vmax.f32 %v938_v28, %v942_v32  ;;  %v953_v42 = vld [vmem:[%s911_s22 + $0xa8] sm:$0xff]  ;;  %v960_v51 = vld [vmem:[%s911_s22 + $0xb0] sm:$0xff]  ;;  %v963_v52 = vld [vmem:[%s911_s22 + $0xb8] sm:$0xff] }
  0x21   : > { %v176_v40 = vmax.f32 %v171_v30, %v650_v16  ;;  %v399_v43 = vmax.f32 %v395_v33, %v938_v28  ;;  %v336_v44 = vmax.f32 %v332_v34, %v655_v22  ;;  %v337_v45 = vmax.f32 %v333_v35, %v656_v26  ;;  %v972_v61 = vld [vmem:[%s911_s22 + $0xc0] sm:$0xff]  ;;  %v975_v62 = vld [vmem:[%s911_s22 + $0xc8] sm:$0xff]  ;;  %v998_v16 = vld [vmem:[%s911_s22 + $0xd0] sm:$0xff] }
  0x22   : > { %v180_v46 = vmax.f32 %v175_v36, %v651_v17  ;;  %v402_v47 = vmax.f32 %v398_v37, %v659_v31  ;;  %v460_v48 = vmax.f32 %v456_v38, %v950_v41  ;;  %v461_v49 = vmax.f32 %v457_v39, %v953_v42 }
  0x23   : > { %v181_v50 = vmax.f32 %v176_v40, %v652_v18  ;;  %v403_v53 = vmax.f32 %v399_v43, %v942_v32  ;;  %v340_v54 = vmax.f32 %v336_v44, %v935_v27  ;;  %v341_v55 = vmax.f32 %v337_v45, %v938_v28  ;;  %v1020_v44 = vld [vmem:[%s911_s22 + $0xd8] sm:$0xff] }
  0x24   : > { %v185_v56 = vmax.f32 %v180_v46, %v653_v20  ;;  %v406_v57 = vmax.f32 %v402_v47, %v950_v41  ;;  %v464_v58 = vmax.f32 %v460_v48, %v960_v51  ;;  %v465_v59 = vmax.f32 %v461_v49, %v963_v52 }
  0x25   : > { %v186_v60 = vmax.f32 %v181_v50, %v654_v21  ;;  %v407_v63 = vmax.f32 %v403_v53, %v953_v42  ;;  %v344_v0 = vmax.f32 %v340_v54, %v659_v31  ;;  %v345_v3 = vmax.f32 %v341_v55, %v942_v32  ;;  %v1026_v54 = vld [vmem:[%s911_s22 + $0xe0] sm:$0xff] }
  0x26   : > { %v190_v4 = vmax.f32 %v185_v56, %v655_v22  ;;  %v410_v5 = vmax.f32 %v406_v57, %v960_v51  ;;  %v981_v7 = vmax.f32 %v464_v58, %v972_v61  ;;  %v984_v8 = vmax.f32 %v465_v59, %v975_v62 }
  0x27   : > { %v191_v9 = vmax.f32 %v186_v60, %v656_v26  ;;  %v411_v10 = vmax.f32 %v407_v63, %v963_v52  ;;  %v988_v11 = vmax.f32 %v344_v0, %v950_v41  ;;  %v991_v12 = vmax.f32 %v345_v3, %v953_v42  ;;  %v1032_v0 = vld [vmem:[%s911_s22 + $0xe8] sm:$0xff]  ;;  %v1035_v3 = vld [vmem:[%s911_s22 + $0xf0] sm:$0xff] }
  0x28   : > { %v199_v13 = vsel %vm198_vm3, %v190_v4, -inf  ;;  %v214_v14 = vsel %vm125_vm1, %v190_v4, -inf  ;;  %v245_v15 = vmax.f32 %v190_v4, %v935_v27  ;;  %v414_v17 = vmax.f32 %v410_v5, %v972_v61 }
  0x29   : > { %v202_v18 = vrot.slane %v199_v13, 4  ;;  %v215_v19 = vsel %vm128_vm2, %v191_v9, -inf  ;;  %v216_v20 = vsel %vm198_vm3, %v214_v14, -inf  ;;  %v233_v21 = vsel %vm198_vm3, %v191_v9, -inf }
  0x2a   : > { %v217_v22 = vsel %vm198_vm3, %v215_v19, -inf  ;;  %v235_v23 = vrot.slane %v233_v21, 4  ;;  %v246_v24 = vmax.f32 %v191_v9, %v938_v28  ;;  %v250_v25 = vmax.f32 %v245_v15, %v659_v31 }
  0x2b   : > { %v203_v26 = vmax.f32 %v199_v13, %v202_v18  ;;  %v218_v27 = vmax.f32 %v216_v20, %v217_v22  ;;  %v415_v29 = vmax.f32 %v411_v10, %v975_v62  ;;  %v418_v30 = vmax.f32 %v414_v17, %v998_v16  ;;  %v1041_v18 = vld [vmem:[%s911_s22 + $0xf8] sm:$0xff] }
  0x2c   : > { %v236_v33 = vmax.f32 %v233_v21, %v235_v23  ;;  %v251_v34 = vmax.f32 %v246_v24, %v942_v32  ;;  %v258_v35 = vsel %vm198_vm3, %v250_v25, -inf  ;;  %v272_v36 = vsel %vm141_vm4, %v250_v25, -inf }
  0x2d   : > { %v204_v37 = vrot.slane %v203_v26, 2  ;;  %v219_v38 = vrot.slane %v218_v27, 4  ;;  %v274_v28 = vsel %vm198_vm3, %v272_v36, -inf  ;;  %v287_v31 = vmax.f32 %v250_v25, %v950_v41 }
  0x2e   : > { %v237_v39 = vrot.slane %v236_v33, 2  ;;  %v257_v40 = vsel %vm138_vm5, %v251_v34, -inf  ;;  %v275_v43 = vsel %vm198_vm3, %v251_v34, -inf  ;;  %v288_v32 = vmax.f32 %v251_v34, %v953_v42 }
  0x2f   : > { %v205_v45 = vmax.f32 %v203_v26, %v204_v37  ;;  %v220_v46 = vmax.f32 %v218_v27, %v219_v38  ;;  %v259_v47 = vsel %vm198_vm3, %v257_v40, -inf  ;;  %v276_v48 = vmax.f32 %v274_v28, %v275_v43 }
  0x30   : > { %v238_v49 = vmax.f32 %v236_v33, %v237_v39  ;;  %v260_v50 = vmax.f32 %v258_v35, %v259_v47  ;;  %v292_v41 = vmax.f32 %v287_v31, %v960_v51  ;;  %v293_v53 = vmax.f32 %v288_v32, %v963_v52 }
  0x31   : > { %v206_v55 = vrot.slane %v205_v45, 1  ;;  %v221_v56 = vrot.slane %v220_v46, 2  ;;  %v277_v42 = vrot.slane %v276_v48, 4  ;;  %v419_v57 = vmax.f32 %v415_v29, %v1020_v44 }
  0x32   : > { %v239_v58 = vrot.slane %v238_v49, 1  ;;  %v261_v59 = vrot.slane %v260_v50, 4  ;;  %v297_v60 = vmax.f32 %v292_v41, %v972_v61  ;;  %v298_v63 = vmax.f32 %v293_v53, %v975_v62 }
  0x33   : > { %v207_v4 = vmax.f32 %v205_v45, %v206_v55  ;;  %v222_v5 = vmax.f32 %v220_v46, %v221_v56  ;;  %v278_v9 = vmax.f32 %v276_v48, %v277_v42  ;;  %v422_v10 = vmax.f32 %v418_v30, %v1026_v54 }
  0x34   : > { %v240_v13 = vmax.f32 %v238_v49, %v239_v58  ;;  %v262_v14 = vmax.f32 %v260_v50, %v261_v59  ;;  %v302_v15 = vmax.f32 %v297_v60, %v998_v16  ;;  %v303_v17 = vmax.f32 %v298_v63, %v1020_v44 }
  0x35   : > { %209 = vst.msk [vmem:[#allocation2 + $0x5] sm:$0x1] %vm208_vm6, %v207_v4  ;;  %v223_v61 = vrot.slane %v222_v5, 1  ;;  %v279_v62 = vrot.slane %v278_v9, 2  ;;  %v423_v19 = vmax.f32 %v419_v57, %v1032_v0  ;;  %v426_v20 = vmax.f32 %v422_v10, %v1035_v3 }
  0x36   : > { %241 = vst.msk [vmem:[#allocation2 + $0x7] sm:$0x1] %vm208_vm6, %v240_v13  ;;  %v263_v21 = vrot.slane %v262_v14, 2  ;;  %v307_v22 = vmax.f32 %v302_v15, %v1026_v54  ;;  %v308_v23 = vmax.f32 %v303_v17, %v1032_v0  ;;  %v352_v24 = vmax.f32 %v988_v11, %v960_v51 }
  0x37   : > { %v224_v25 = vmax.f32 %v222_v5, %v223_v61  ;;  %v280_v26 = vmax.f32 %v278_v9, %v279_v62  ;;  %v427_v27 = vmax.f32 %v423_v19, %v1041_v18  ;;  %v430_v29 = vsel %vm198_vm3, %v426_v20, -inf }
  0x38   : > { %v264_v30 = vmax.f32 %v262_v14, %v263_v21  ;;  %v312_v33 = vmax.f32 %v307_v22, %v1035_v3  ;;  %v313_v34 = vmax.f32 %v308_v23, %v1041_v18  ;;  %v440_v35 = vsel %vm141_vm4, %v426_v20, -inf }
  0x39   : > { %225 = vst.msk [vmem:[#allocation2 + $0x6] sm:$0x1] %vm208_vm6, %v224_v25  ;;  %v281_v36 = vrot.slane %v280_v26, 1  ;;  %v429_v51 = vsel %vm138_vm5, %v427_v27, -inf  ;;  %v442_v11 = vsel %vm198_vm3, %v440_v35, -inf  ;;  %v443_v37 = vsel %vm198_vm3, %v427_v27, -inf }
  0x3a   : > { %v265_v38 = vrot.slane %v264_v30, 1  ;;  %v314_v28 = vsel %vm198_vm3, %v312_v33, -inf  ;;  %v315_v31 = vsel %vm198_vm3, %v313_v34, -inf  ;;  %v431_v39 = vsel %vm198_vm3, %v429_v51, -inf }
  0x3b   : > { %v282_v40 = vmax.f32 %v280_v26, %v281_v36  ;;  %v316_v43 = vmax.f32 %v314_v28, %v315_v31  ;;  %v432_v32 = vmax.f32 %v430_v29, %v431_v39  ;;  %v444_v45 = vmax.f32 %v442_v11, %v443_v37 }
  0x3c   : > { %v266_v46 = vmax.f32 %v264_v30, %v265_v38  ;;  %v353_v47 = vmax.f32 %v991_v12, %v963_v52  ;;  %v356_v48 = vsel %vm198_vm3, %v352_v24, -inf  ;;  %v366_v49 = vsel %vm125_vm1, %v352_v24, -inf }
  0x3d   : > { %283 = vst.msk [vmem:[#allocation2 + $0x2] sm:$0x1] %vm208_vm6, %v282_v40  ;;  %v317_v50 = vrot.slane %v316_v43, 4  ;;  %v433_v41 = vrot.slane %v432_v32, 4  ;;  %v445_v53 = vrot.slane %v444_v45, 4  ;;  %v359_v55 = vrot.slane %v356_v48, 4 }
  0x3e   : > { %267 = vst.msk [vmem:[#allocation2 + $0x1] sm:$0x1] %vm208_vm6, %v266_v46  ;;  %v367_v56 = vsel %vm128_vm2, %v353_v47, -inf  ;;  %v368_v42 = vsel %vm198_vm3, %v366_v49, -inf  ;;  %v381_v52 = vsel %vm198_vm3, %v353_v47, -inf  ;;  %v472_v12 = vmax.f32 %v981_v7, %v998_v16 }
  0x3f   : > { %v318_v57 = vmax.f32 %v316_v43, %v317_v50  ;;  %v434_v58 = vmax.f32 %v432_v32, %v433_v41  ;;  %v446_v59 = vmax.f32 %v444_v45, %v445_v53  ;;  %v360_v60 = vmax.f32 %v356_v48, %v359_v55 }
  0x40   : > { %v369_v63 = vsel %vm198_vm3, %v367_v56, -inf  ;;  %v383_v4 = vrot.slane %v381_v52, 4  ;;  %v473_v5 = vmax.f32 %v984_v8, %v1020_v44  ;;  %v476_v9 = vmax.f32 %v472_v12, %v1026_v54 }
  0x41   : > { %v319_v10 = vrot.slane %v318_v57, 2  ;;  %v435_v13 = vrot.slane %v434_v58, 2  ;;  %v447_v14 = vrot.slane %v446_v59, 2  ;;  %v361_v15 = vrot.slane %v360_v60, 2 }
  0x42   : > { %v370_v17 = vmax.f32 %v368_v42, %v369_v63  ;;  %v384_v61 = vmax.f32 %v381_v52, %v383_v4  ;;  %v477_v7 = vmax.f32 %v473_v5, %v1032_v0  ;;  %v480_v16 = vmax.f32 %v476_v9, %v1035_v3 }
  0x43   : > { %v320_v62 = vmax.f32 %v318_v57, %v319_v10  ;;  %v436_v19 = vmax.f32 %v434_v58, %v435_v13  ;;  %v448_v20 = vmax.f32 %v446_v59, %v447_v14  ;;  %v362_v21 = vmax.f32 %v360_v60, %v361_v15 }
  0x44   : > { %v371_v22 = vrot.slane %v370_v17, 4  ;;  %v385_v23 = vrot.slane %v384_v61, 2  ;;  %v481_v8 = vmax.f32 %v477_v7, %v1041_v18  ;;  %v484_v44 = vsel %vm198_vm3, %v480_v16, -inf }
  0x45   : > { %v321_v54 = vrot.slane %v320_v62, 1  ;;  %v437_v24 = vrot.slane %v436_v19, 1  ;;  %v449_v25 = vrot.slane %v448_v20, 1  ;;  %v363_v26 = vrot.slane %v362_v21, 1 }
  0x46   : > { %v372_v27 = vmax.f32 %v370_v17, %v371_v22  ;;  %v386_v29 = vmax.f32 %v384_v61, %v385_v23  ;;  %v487_v30 = vrot.slane %v484_v44, 4  ;;  %v494_v0 = vsel %vm125_vm1, %v480_v16, -inf }
  0x47   : > { %v322_v3 = vmax.f32 %v320_v62, %v321_v54  ;;  %v438_v33 = vmax.f32 %v436_v19, %v437_v24  ;;  %v450_v34 = vmax.f32 %v448_v20, %v449_v25  ;;  %v364_v35 = vmax.f32 %v362_v21, %v363_v26 }
  0x48   : > { %v373_v36 = vrot.slane %v372_v27, 2  ;;  %v387_v51 = vrot.slane %v386_v29, 1  ;;  %v488_v11 = vmax.f32 %v484_v44, %v487_v30  ;;  %v495_v18 = vsel %vm128_vm2, %v481_v8, -inf }
  0x49   : > { %323 = vst.msk [vmem:[#allocation2] sm:$0x1] %vm208_vm6, %v322_v3  ;;  %439 = vst.msk [vmem:[#allocation2 + $0x3] sm:$0x1] %vm208_vm6, %v438_v33  ;;  %v496_v37 = vsel %vm198_vm3, %v494_v0, -inf  ;;  %v497_v38 = vsel %vm198_vm3, %v495_v18, -inf }
  0x4a   : > { %451 = vst.msk [vmem:[#allocation2 + $0x4] sm:$0x1] %vm208_vm6, %v450_v34  ;;  %365 = vst.msk [vmem:[#allocation2 + $0x8] sm:$0x1] %vm208_vm6, %v364_v35  ;;  %v509_v28 = vsel %vm198_vm3, %v481_v8, -inf  ;;  %v374_v31 = vmax.f32 %v372_v27, %v373_v36  ;;  %v388_v39 = vmax.f32 %v386_v29, %v387_v51  ;;  %v489_v40 = vrot.slane %v488_v11, 2 }
  0x4b   : > { %v498_v43 = vmax.f32 %v496_v37, %v497_v38  ;;  %v511_v32 = vrot.slane %v509_v28, 4  ;;  %v843_v27 = vmov 1.0   ;;  %v642_v33 = vsel %vm146_vm12, 1.0, %v842_v1 }
  0x4c   : > { %v375_v45 = vrot.slane %v374_v31, 1  ;;  %389 = vst.msk [vmem:[#allocation2 + $0xa] sm:$0x1] %vm208_vm6, %v388_v39  ;;  %v490_v46 = vmax.f32 %v488_v11, %v489_v40  ;;  %v153_v29 = vsel %vm151_vm11, 2.0, %v843_v27 }
  0x4d   : > { %v499_v47 = vrot.slane %v498_v43, 4  ;;  %v512_v48 = vmax.f32 %v509_v28, %v511_v32 }
  0x4e   : > { %v376_v49 = vmax.f32 %v374_v31, %v375_v45  ;;  %v491_v50 = vrot.slane %v490_v46, 1 }
  0x4f   : > { %v500_v41 = vmax.f32 %v498_v43, %v499_v47  ;;  %v513_v53 = vrot.slane %v512_v48, 2 }
  0x50   : > { %377 = vst.msk [vmem:[#allocation2 + $0x9] sm:$0x1] %vm208_vm6, %v376_v49  ;;  %v492_v56 = vmax.f32 %v490_v46, %v491_v50 }
  0x51   : > { %v518_v55 = vld [vmem:[#allocation2] sm:$0xff]  ;;  %v501_v42 = vrot.slane %v500_v41, 2  ;;  %v514_v12 = vmax.f32 %v512_v48, %v513_v53 }
  0x52   : > { %v520_v52 = vmul.f32 %v518_v55, %v518_v55  ;;  %493 = vst.msk [vmem:[#allocation2 + $0xb] sm:$0x1] %vm208_vm6, %v492_v56 }
  0x53   : > { %v502_v57 = vmax.f32 %v500_v41, %v501_v42  ;;  %v515_v59 = vrot.slane %v514_v12, 1 }
  0x54   : > { %v522_v58 = vsel %vm198_vm3, %v520_v52, 0.0 }
  0x55   : > { %523 = vadd.xlane.f32.xlu0 %v522_v58  ;;  %v503_v60 = vrot.slane %v502_v57, 1  ;;  %v516_v63 = vmax.f32 %v514_v12, %v515_v59 }
  0x57   : > { %v504_v4 = vmax.f32 %v502_v57, %v503_v60  ;;  %517 = vst.msk [vmem:[#allocation2 + $0xd] sm:$0x1] %vm208_vm6, %v516_v63 }
  0x59   : > { %505 = vst.msk [vmem:[#allocation2 + $0xc] sm:$0x1] %vm208_vm6, %v504_v4 }
  0x60   : > { %v519_v5 = vld [vmem:[#allocation2 + $0x8] sm:$0xff] }
  0x61   : > { %v521_v9 = vmul.f32 %v519_v5, %v519_v5 }
  0x63   : > { %v525_v10 = vsel %vm198_vm3, %v521_v9, 0.0 }
  0x64   : > { %526 = vadd.xlane.f32.xlu0 %v525_v10 }
  0xe2   : > { %v524_v13 = vpop.xlane.xlu0 %523 }
  0xe3   : > { %770 = vrsqrt.f32 %v524_v13  ;;  %vm532_vm7 = vcmp.eq.f32.partialorder %v524_v13, inf  ;;  %v535_v17 = vand.u32 2147483648, %v524_v13  ;;  %vm534_vm8 = vcmp.eq.f32.partialorder %v524_v13, 0.0 }
  0xed   : > { %v771_v14 = vpop.eup %770 }
  0xee   : > { %v531_v15 = vmul.f32 %v771_v14, %v524_v13 }
  0xf0   : > { %v533_v61 = vsel %vm532_vm7, %v524_v13, %v531_v15 }
  0xf1   : > { %v527_v7 = vpop.xlane.xlu0 %526  ;;  %v536_v16 = vsel %vm534_vm8, %v535_v17, %v533_v61 }
  0xf2   : > { %772 = vrsqrt.f32 %v527_v7  ;;  %v544_v62 = vadd.f32 1e-06, %v536_v16  ;;  %vm539_vm9 = vcmp.eq.f32.partialorder %v527_v7, inf  ;;  %v542_v21 = vand.u32 2147483648, %v527_v7 }
  0xf3   : > { %vm541_vm10 = vcmp.eq.f32.partialorder %v527_v7, 0.0 }
  0xf4   : > { %774 = vrcp.f32 %v544_v62 }
  0xfc   : > { %v773_v19 = vpop.eup %772 }
  0xfd   : > { %v538_v20 = vmul.f32 %v773_v19, %v527_v7 }
  0xfe   : > { %v775_v8 = vpop.eup %774 }
  0xff   : > { %v540_v22 = vsel %vm539_vm9, %v527_v7, %v538_v20  ;;  %v548_v54 = vmul.f32 %v775_v8, %v544_v62 }
 0x100   : > { %v543_v23 = vsel %vm541_vm10, %v542_v21, %v540_v22 }
 0x101   : > { %v545_v44 = vadd.f32 1e-06, %v543_v23  ;;  %v550_v24 = vsub.f32 2.0, %v548_v54 }
 0x103   : > { %776 = vrcp.f32 %v545_v44  ;;  %v552_v25 = vmul.f32 %v775_v8, %v550_v24 }
 0x105   : > { %v554_v3 = vmul.f32 %v552_v25, %v153_v29 }
 0x107   : > { %v556_v36 = vmul.f32 %v554_v3, %v518_v55 }
 0x109   : > { %v558_v11 = vsel %vm198_vm3, %v556_v36, 0.0 }
 0x10d   : > { %v777_v26 = vpop.eup %776 }
 0x10e   : > { %v549_v30 = vmul.f32 %v777_v26, %v545_v44 }
 0x110   : > { %v551_v0 = vsub.f32 2.0, %v549_v30 }
 0x112   : > { %v553_v34 = vmul.f32 %v777_v26, %v551_v0 }
 0x114   : > { %v555_v35 = vmul.f32 %v642_v33, %v553_v34 }
 0x116   : > { %v557_v51 = vmul.f32 %v555_v35, %v519_v5 }
 0x118   : > { %v559_v2 = vsel %vm198_vm3, %v557_v51, 0.0 }
 0x119   : > { %v560_v18 = vadd.f32 %v559_v2, %v558_v11 }
 0x11b   : > { %v561_v37 = vrot.slane %v560_v18, 4 }
 0x11d   : > { %v562_v38 = vadd.f32 %v561_v37, %v560_v18 }
 0x11f   : > { %v563_v6 = vrot.slane %v562_v38, 2 }
 0x121   : > { %v564_v28 = vadd.f32 %v563_v6, %v562_v38 }
 0x123   : > { %v565_v31 = vrot.slane %v564_v28, 1 }
 0x125   : > { %v566_v1 = vadd.f32 %v565_v31, %v564_v28 }
 0x127   : > { %567 = vst.msk [vmem:[%s108_s25] sm:$0x1] %vm208_vm6, %v566_v1 }
 0x128   : > { %791 = shalt.err (!%p788_p3)
}
 0x129   : > { %s792_s10 = scalar_lea.hbm %s1114_s29, 16  ;;  %s796_s14 = scalar_lea.hbm %s1158_s1, 32 }
 0x12a   : > { %p793_p4 = scmp.ne.s32.totalorder %s1114_s29, %s792_s10  ;;  %p797_p9 = scmp.lt.u32.totalorder %s1114_s29, %s1158_s1 }
 0x12b   : > { %p798_p10 = scmp.lt.u32.totalorder %s796_s14, %s792_s10  ;;  %p800_p12 = scmp.lt.u32.totalorder %s792_s10, %s1114_s29 }
 0x12c   : > { %p794_p7 = pnand %p793_p4, %p893_p5 }
 0x12d   : > { %p799_p11 = por %p798_p10, %p797_p9 }
 0x12e   : > { %p795_p8 = pneg %p794_p7 }
 0x12f   : > { %p801_p13 = por %p800_p12, %p799_p11 }
 0x131   : > { %p802_p0 = pnand %p801_p13, %p795_p8 }
 0x133   : > { %805 = shalt.err (!%p802_p0)
}
 0x134   : > { %729 = dma.vmem_to_hbm [thread:$0]  (%p893_p5), %s1116_s26, 16, %s1114_s29, %s569_s30  }
 0x135 PF: > { %p735_p1 = scmp.ge.s32.totalorder %s840_s9, 2  ;;  %s593_s20 = sand.u32 1, %s828_s6  }
 0x136   : > { %s594_s21 = scalar_lea.sflag [#allocation4], %s593_s20 }
 0x137   : > { %p732_p2 = pnand %p735_p1, %p897_p6 }
 0x139   : > { %823 = dma.done.wait (!%p732_p2), %s594_s21, 16  }
 0x13a   : > { %825 = vsyncadd (!%p732_p2), %s594_s21, 4294967280  ;;  %p11_p3 = scmp.ge.s32.totalorder %s880_s12, 4   ;;  %s1161_s6 = smov %s832_s7 }
 0x13b   : > { %s1162_s7 = smov %s836_s8  ;;  %s1163_s8 = smov %s891_s15 }
 0x13c   : > { %s1164_s9 = smov %s880_s12  ;;  %13 = sbr.rel (!%p11_p3) target bundleno = 3 (0x3), region = 74 }
 0x143   :  { %598 = vsyncpa [#allocation4], 1 }
 0x144   :  { %600 = vsyncpa [#allocation4 + $0x1], 1 }

</bundles_post_ra>
